<compile_context>
chip_gen: v6e
topology: v6e:2x2x1
jax: 0.10.0
libtpu: 0.0.40
codegen_flags: <defaults>
</compile_context>

<pallas_src>
import functools

import jax
import jax.numpy as jnp
from jax.experimental import pallas as pl
from jax.experimental.pallas import tpu as pltpu


# ---------------------------------------------------------------------------
# Kernel bodies
# ---------------------------------------------------------------------------
def _mlp_from_slab(x, slab_ref, D, H):
    """3-layer MLP with Hardtanh(-5, 5); weights read via static slab views."""
    r = 0
    w1 = slab_ref[r:r + D, 0:H]; r += D          # (D, H)
    b1 = slab_ref[r:r + 1, 0:H]; r += 1          # (1, H)
    w2 = slab_ref[r:r + H, 0:H]; r += H          # (H, H)
    b2 = slab_ref[r:r + 1, 0:H]; r += 1          # (1, H)
    w3 = slab_ref[r:r + H, 0:D]; r += H          # (H, D)
    b3 = slab_ref[r:r + 1, 0:D]                  # (1, D)

    h = jnp.dot(x, w1, preferred_element_type=jnp.float32) + b1
    h = jnp.clip(h, -5.0, 5.0)                   # Hardtanh(-5, 5)
    h = jnp.dot(h, w2, preferred_element_type=jnp.float32) + b2
    h = jnp.clip(h, -5.0, 5.0)
    h = jnp.dot(h, w3, preferred_element_type=jnp.float32) + b3
    h = jnp.clip(h, -5.0, 5.0)
    return h


def _kernel_flat(x_ref, slab_ref, o_ref, *, D, H, B):
    """Grid-less path: o_ref is (2B, D) = cat((x0, mlp(x0)), axis=0)."""
    x = x_ref[...]
    h = _mlp_from_slab(x, slab_ref, D, H)
    # Fused torch.cat along axis 0: two static sub-stores, no concat op.
    o_ref[0:B, :] = x
    o_ref[B:2 * B, :] = h.astype(o_ref.dtype)


def _kernel_tiled(x_ref, slab_ref, o_ref, *, D, H):
    """Batched path: o_ref block is (2, tb, D); slab stays VMEM-resident."""
    x = x_ref[...]
    h = _mlp_from_slab(x, slab_ref, D, H)
    o_ref[0] = x
    o_ref[1] = h.astype(o_ref.dtype)


# ---------------------------------------------------------------------------
# Host-side packing + wrapper
# ---------------------------------------------------------------------------
def pack_params(params, dim, nhidden):
    """Pack (w1,b1,w2,b2,w3,b3) into one (2H+D+3, H) f32 slab (single DMA)."""
    w1, b1, w2, b2, w3, b3 = params
    H = nhidden

    def pad_cols(a):
        return jnp.pad(a.astype(jnp.float32), ((0, 0), (0, H - a.shape[1])))

    slab = jnp.concatenate(
        [pad_cols(w1), pad_cols(b1),
         pad_cols(w2), pad_cols(b2),
         pad_cols(w3), pad_cols(b3)], axis=0)
    assert slab.shape == (2 * nhidden + dim + 3, H)
    return slab


def initial_velocity_forward(x0, slab, dim, nhidden, *, row_tile=512):
    """x0: (B, D).  Returns (2*B, D) = cat((x0, mlp(x0)), axis=0)."""
    B, D = x0.shape
    H = nhidden
    assert D == dim

    # Advisory cost hint for XLA's scheduler (kernel sits inside hot loops).
    flops = 2 * B * (D * H + H * H + H * D)
    bytes_accessed = int(x0.size * x0.dtype.itemsize
                         + slab.size * slab.dtype.itemsize
                         + 2 * B * D * x0.dtype.itemsize)
    cost = pl.CostEstimate(flops=flops, transcendentals=0,
                           bytes_accessed=bytes_accessed)

    vmem = pl.BlockSpec(memory_space=pltpu.MemorySpace.VMEM)

    if B <= row_tile:
        # Tiny problem: grid-less, everything mapped whole into VMEM (<20 KB).
        kernel = functools.partial(_kernel_flat, D=D, H=H, B=B)
        return pl.pallas_call(
            kernel,
            out_shape=jax.ShapeDtypeStruct((2 * B, D), x0.dtype),
            in_specs=[vmem, vmem],
            out_specs=vmem,
            cost_estimate=cost,
        )(x0, slab)

    # Batched path: grid over row tiles; the weight slab's index_map returns
    # (0, 0) so it is DMA'd once and stays resident across the whole grid.
    tb = row_tile
    kernel = functools.partial(_kernel_tiled, D=D, H=H)
    out = pl.pallas_call(
        kernel,
        out_shape=jax.ShapeDtypeStruct((2, B, D), x0.dtype),
        grid=(pl.cdiv(B, tb),),
        in_specs=[pl.BlockSpec((tb, D), lambda i: (i, 0)),
                  pl.BlockSpec(slab.shape, lambda i: (0, 0))],
        out_specs=pl.BlockSpec((2, tb, D), lambda i: (0, i, 0)),
        compiler_params=pltpu.CompilerParams(
            # Keep it on one TensorCore: cross-core split is not worth ~3
            # MXU pushes of work per tile (per review).
            dimension_semantics=("arbitrary",)),
        cost_estimate=cost,
    )(x0, slab)
    # (2, B, D) -> (2B, D) is a contiguous row-major reshape == axis-0 concat.
    return out.reshape(2 * B, D)


# ---------------------------------------------------------------------------
# Init + reference
# ---------------------------------------------------------------------------
def init_params(key, dim, nhidden, dtype=jnp.float32):
    """Deterministic init mimicking nn.Linear's U(-1/sqrt(fan_in), ...)."""
    ks = jax.random.split(key, 6)

    def lin(kw, kb, fan_in, fan_out):
        bound = 1.0 / jnp.sqrt(jnp.asarray(fan_in, dtype))
        w = jax.random.uniform(kw, (fan_in, fan_out), dtype, -bound, bound)
        b = jax.random.uniform(kb, (1, fan_out), dtype, -bound, bound)
        return w, b

    w1, b1 = lin(ks[0], ks[1], dim, nhidden)
    w2, b2 = lin(ks[2], ks[3], nhidden, nhidden)
    w3, b3 = lin(ks[4], ks[5], nhidden, dim)
    return (w1, b1, w2, b2, w3, b3)


def _reference(x0, params):
    w1, b1, w2, b2, w3, b3 = params
    h = jnp.clip(x0 @ w1 + b1, -5.0, 5.0)
    h = jnp.clip(h @ w2 + b2, -5.0, 5.0)
    h = jnp.clip(h @ w3 + b3, -5.0, 5.0)
    return jnp.concatenate([x0, h], axis=0)


if __name__ == "__main__":
    dim, nhidden, batch = 4, 32, 8

    key = jax.random.PRNGKey(0)
    k_x, k_p = jax.random.split(key)
    x0 = jax.random.normal(k_x, (batch, dim), dtype=jnp.float32)
    params = init_params(k_p, dim, nhidden)
    slab = pack_params(params, dim, nhidden)

    # Grid-less path (matches the module's per-call shape).
    out = initial_velocity_forward(x0, slab, dim, nhidden)
    out = jax.block_until_ready(out)
    ref = _reference(x0, params)
    assert out.shape == (2 * batch, dim), out.shape
    assert jnp.allclose(out, ref, atol=1e-5, rtol=1e-5), "flat path mismatch"

    # Batched/gridded path: weights VMEM-resident across the grid.
    x_big = jax.random.normal(jax.random.PRNGKey(1), (64, dim), dtype=jnp.float32)
    out_big = initial_velocity_forward(x_big, slab, dim, nhidden, row_tile=16)
    out_big = jax.block_until_ready(out_big)
    ref_big = _reference(x_big, params)
    assert out_big.shape == (128, dim), out_big.shape
    assert jnp.allclose(out_big, ref_big, atol=1e-5, rtol=1e-5), "tiled path mismatch"

    print("KERNEL_OK")
</pallas_src>

<mosaic_0001>
module attributes {stable_mosaic.version = 11 : i64} {
  func.func @_kernel_flat(%arg0: memref<8x4xf32, #tpu.memory_space<vmem>>, %arg1: memref<71x32xf32, #tpu.memory_space<vmem>>, %arg2: memref<16x4xf32, #tpu.memory_space<vmem>>) attributes {dimension_semantics = [], scalar_prefetch = 0 : i64, scratch_operands = 0 : i64, tpu.core_type = #tpu.core_type<tc>} {
    %c0 = arith.constant 0 : index
    %c0_0 = arith.constant 0 : index
    %0 = vector.load %arg0[%c0, %c0_0] : memref<8x4xf32, #tpu.memory_space<vmem>>, vector<8x4xf32>
    %c0_1 = arith.constant 0 : index
    %c0_2 = arith.constant 0 : index
    %1 = vector.load %arg1[%c0_1, %c0_2] : memref<71x32xf32, #tpu.memory_space<vmem>>, vector<4x32xf32>
    %c4 = arith.constant 4 : index
    %c0_3 = arith.constant 0 : index
    %2 = vector.load %arg1[%c4, %c0_3] : memref<71x32xf32, #tpu.memory_space<vmem>>, vector<1x32xf32>
    %c5 = arith.constant 5 : index
    %c0_4 = arith.constant 0 : index
    %3 = vector.load %arg1[%c5, %c0_4] : memref<71x32xf32, #tpu.memory_space<vmem>>, vector<32x32xf32>
    %c37 = arith.constant 37 : index
    %c0_5 = arith.constant 0 : index
    %4 = vector.load %arg1[%c37, %c0_5] : memref<71x32xf32, #tpu.memory_space<vmem>>, vector<1x32xf32>
    %c38 = arith.constant 38 : index
    %c0_6 = arith.constant 0 : index
    %5 = vector.load %arg1[%c38, %c0_6] : memref<71x32xf32, #tpu.memory_space<vmem>>, vector<32x4xf32>
    %c70 = arith.constant 70 : index
    %c0_7 = arith.constant 0 : index
    %6 = vector.load %arg1[%c70, %c0_7] : memref<71x32xf32, #tpu.memory_space<vmem>>, vector<1x4xf32>
    %cst = arith.constant dense<0.000000e+00> : vector<8x32xf32>
    %7 = tpu.matmul %0, %1, %cst {dimension_numbers = #tpu.dot_dimension_numbers<[1], [0], [0], [1], [0, 0, 1, 1], [], []>} : vector<8x4xf32>, vector<4x32xf32>, vector<8x32xf32> -> vector<8x32xf32>
    %8 = vector.broadcast %2 : vector<1x32xf32> to vector<8x32xf32>
    %9 = arith.addf %7, %8 : vector<8x32xf32>
    %cst_8 = arith.constant -5.000000e+00 : f32
    %cst_9 = arith.constant 5.000000e+00 : f32
    %10 = vector.broadcast %cst_8 : f32 to vector<8x32xf32>
    %11 = arith.maximumf %10, %9 : vector<8x32xf32>
    %12 = vector.broadcast %cst_9 : f32 to vector<8x32xf32>
    %13 = arith.minimumf %12, %11 : vector<8x32xf32>
    %cst_10 = arith.constant dense<0.000000e+00> : vector<8x32xf32>
    %14 = tpu.matmul %13, %3, %cst_10 {dimension_numbers = #tpu.dot_dimension_numbers<[1], [0], [0], [1], [0, 0, 1, 1], [], []>} : vector<8x32xf32>, vector<32x32xf32>, vector<8x32xf32> -> vector<8x32xf32>
    %15 = vector.broadcast %4 : vector<1x32xf32> to vector<8x32xf32>
    %16 = arith.addf %14, %15 : vector<8x32xf32>
    %cst_11 = arith.constant -5.000000e+00 : f32
    %cst_12 = arith.constant 5.000000e+00 : f32
    %17 = vector.broadcast %cst_11 : f32 to vector<8x32xf32>
    %18 = arith.maximumf %17, %16 : vector<8x32xf32>
    %19 = vector.broadcast %cst_12 : f32 to vector<8x32xf32>
    %20 = arith.minimumf %19, %18 : vector<8x32xf32>
    %cst_13 = arith.constant dense<0.000000e+00> : vector<8x4xf32>
    %21 = tpu.matmul %20, %5, %cst_13 {dimension_numbers = #tpu.dot_dimension_numbers<[1], [0], [0], [1], [0, 0, 1, 1], [], []>} : vector<8x32xf32>, vector<32x4xf32>, vector<8x4xf32> -> vector<8x4xf32>
    %22 = vector.broadcast %6 : vector<1x4xf32> to vector<8x4xf32>
    %23 = arith.addf %21, %22 : vector<8x4xf32>
    %cst_14 = arith.constant -5.000000e+00 : f32
    %cst_15 = arith.constant 5.000000e+00 : f32
    %24 = vector.broadcast %cst_14 : f32 to vector<8x4xf32>
    %25 = arith.maximumf %24, %23 : vector<8x4xf32>
    %26 = vector.broadcast %cst_15 : f32 to vector<8x4xf32>
    %27 = arith.minimumf %26, %25 : vector<8x4xf32>
    %c0_16 = arith.constant 0 : index
    %c0_17 = arith.constant 0 : index
    %28 = vector.load %arg2[%c0_16, %c0_17] : memref<16x4xf32, #tpu.memory_space<vmem>>, vector<8x4xf32>
    tpu.vector_store %arg2[%c0_16, %c0_17], %0 {strides = array<i32>} : memref<16x4xf32, #tpu.memory_space<vmem>>, vector<8x4xf32>,
    %c8 = arith.constant 8 : index
    %c0_18 = arith.constant 0 : index
    %29 = vector.load %arg2[%c8, %c0_18] : memref<16x4xf32, #tpu.memory_space<vmem>>, vector<8x4xf32>
    tpu.vector_store %arg2[%c8, %c0_18], %27 {strides = array<i32>} : memref<16x4xf32, #tpu.memory_space<vmem>>, vector<8x4xf32>,
    return
  }
}

</mosaic_0001>

<bundles_post_ra>
// kernel: tpu_custom_call.1
= control target key start
LH: loop header
LB: loop body
LE: loop exit
PB: predicated region body
PF: predicated region fallthrough
CT: control target
= control target key end

     0   :  { %vm32_vm0 = vcmask 1043456   ;;  %vm28_vm1 = vcmask 31744   ;;  %v324_v0 = vmov 0.0   ;;  %vm325_vm2 = vmmov 0   ;;  %s391_s1 = inlined_call_operand.vmem [shape: f32[71,32], index: 1, kind: input, shape index: {}]   ;;  %s392_s0 = inlined_call_operand.vmem [shape: f32[8,4], index: 0, kind: input, shape index: {}]   ;;  %s393_s2 = inlined_call_operand.vmem [shape: f32[16,4], index: 2, kind: output, shape index: {}]  }
   0x1   :  { %295 = vmatprep.subr.mxu0 %v324_v0  ;;  %v12_v1 = vld [vmem:[%s391_s1] sm:$0xf]  ;;  %297 = vmatprep.mubr.msk.f32.mxu0 %vm325_vm2, %v324_v0  ;;  %v16_v4 = vld [vmem:[%s391_s1 + $0x15] sm:$0xff]  ;;  %v15_v5 = vld [vmem:[%s391_s1 + $0xd] sm:$0xff]  ;;  %vm112_vm3 = vcmask 261120  }
   0x2   :  { %v11_v2 = vld [vmem:[%s392_s0] sm:$0xff]  ;;  %296 = vmatpush3.msk.msra.mxu0 %vm32_vm0, %v12_v1  ;;  %300 = vmatprep.subr.mxu1 %v324_v0  ;;  %v21_v13 = vld [vmem:[%s391_s1 + $0x36] sm:$0xff]  ;;  %v20_v14 = vld [vmem:[%s391_s1 + $0x2e] sm:$0xff] }
   0x3   :  { %v17_v3 = vld [vmem:[%s391_s1 + $0x1d] sm:$0xff]  ;;  %267 = vst.msk [vmem:[%s393_s2] sm:$0xff] %vm28_vm1, %v11_v2  ;;  %298 = vmatmul.mubr.msk.f32.vlgmr.msra.gmra.mxu0 %vm28_vm1, %v11_v2  ;;  %308 = vmatprep.mubr.msk.f32.mxu1 %vm325_vm2, %v324_v0  ;;  %v14_v6 = vld [vmem:[%s391_s1 + $0x5] sm:$0xff] }
   0x4   :  { %301 = vmatpush3.msra.mxu1 %v17_v3  ;;  %311 = vmatprep.subr.mxu0 %v324_v0  ;;  %v22_v7 = vld [vmem:[%s391_s1 + $0x3e] sm:$0xff]  ;;  %v19_v15 = vld [vmem:[%s391_s1 + $0x26] sm:$0xff] }
   0x5   :  { %302 = vmatprep.subr.mxu1 %v324_v0  ;;  %319 = vmatprep.mubr.msk.f32.mxu0 %vm325_vm2, %v324_v0  ;;  %v273_v8 = vld [vmem:[%s391_s1 + $0x4] ss:$0 sm:$0xff]  ;;  %v277_v16 = vld [vmem:[%s391_s1 + $0x25] ss:$0 sm:$0xff]  ;;  %v280_v21 = vld [vmem:[%s391_s1 + $0x46] ss:$0 sm:$0xff] }
   0x6   :  { %303 = vmatpush3.msra.mxu1 %v16_v4  ;;  %312 = vmatpush3.msra.mxu0 %v22_v7 }
   0x7   :  { %304 = vmatprep.subr.mxu1 %v324_v0  ;;  %313 = vmatprep.subr.mxu0 %v324_v0 }
   0x8   :  { %305 = vmatpush3.msra.mxu1 %v15_v5  ;;  %314 = vmatpush3.msra.mxu0 %v21_v13 }
   0x9   :  { %306 = vmatprep.subr.mxu1 %v324_v0  ;;  %315 = vmatprep.subr.mxu0 %v324_v0 }
   0xa   :  { %307 = vmatpush3.msra.mxu1 %v14_v6  ;;  %316 = vmatpush3.msra.mxu0 %v20_v14 }
   0xb   :  { %317 = vmatprep.subr.mxu0 %v324_v0 }
   0xc   :  { %318 = vmatpush3.msra.mxu0 %v19_v15 }
  0xc3   :  { %v102_v9 = vpop.f32.mrf.mxu0 }
  0xc4   :  { %v103_v10 = vadd.f32 %v273_v8, %v102_v9 }
  0xc5   :  { %v299_v11 = vpop.f32.mrf.mxu0 }
  0xc6   :  { %v276_v12 = vclamps-f32 %v103_v10, 5.0 }
  0xc8   :  { %309 = vmatmul.mubr.msk.f32.vlgmr.msra.gmra.mxu1 %vm112_vm3, %v276_v12 }
 0x188   :  { %v182_v17 = vpop.f32.mrf.mxu1 }
 0x189   :  { %v183_v18 = vadd.f32 %v277_v16, %v182_v17 }
 0x18a   :  { %v310_v19 = vpop.f32.mrf.mxu1 }
 0x18b   :  { %v279_v20 = vclamps-f32 %v183_v18, 5.0 }
 0x18d   :  { %320 = vmatmul.mubr.msk.f32.vlgmr.msra.gmra.mxu0 %vm112_vm3, %v279_v20 }
 0x24d   :  { %v261_v22 = vpop.f32.mrf.mxu0 }
 0x24e   :  { %v262_v23 = vadd.f32 %v280_v21, %v261_v22 }
 0x24f   :  { %v321_v24 = vpop.f32.mrf.mxu0 }
 0x250   :  { %v282_v25 = vclamps-f32 %v262_v23, 5.0 }
 0x252   :  { %268 = vst.msk [vmem:[%s393_s2 + $0x8] sm:$0xff] %vm28_vm1, %v282_v25 }

</bundles_post_ra>
